<compile_context>
chip_gen: v7x
topology: tpu7x:2x2x1
jax: 0.10.0
libtpu: 0.0.40
codegen_flags: <defaults>
</compile_context>

<pallas_src>
import jax
import jax.numpy as jnp
from jax.experimental import pallas as pl
from jax.experimental.pallas import tpu as pltpu


# ---------------------------------------------------------------------------
# Helpers
# ---------------------------------------------------------------------------
def _round_up(x: int, m: int) -> int:
    return ((x + m - 1) // m) * m


def _pick_tiles(B, H, n_bufs, itemsize, tile_b=None, tile_h=None,
                vmem_budget=12 * 1024 * 1024):
    """Pick (TB, TH): TB multiple of 8, TH multiple of 128, sized so that
    n_bufs double-buffered f32 tiles fit comfortably in scoped VMEM on every
    TPU generation (v7x has half the VMEM of v5e/v6e)."""
    TB = tile_b if tile_b is not None else min(_round_up(B, 8), 256)
    TH = tile_h if tile_h is not None else min(_round_up(H, 128), 2048)
    TB, TH = _round_up(TB, 8), _round_up(TH, 128)

    def fits(tb, th):
        return n_bufs * 2 * tb * th * itemsize <= vmem_budget

    while not fits(TB, TH) and TH > 512:
        TH = max(512, ((TH // 2) // 128) * 128)
    while not fits(TB, TH) and TB > 8:
        TB = max(8, ((TB // 2) // 8) * 8)
    while not fits(TB, TH) and TH > 128:
        TH = max(128, ((TH // 2) // 128) * 128)
    return TB, TH


_COMPILER_PARAMS = pltpu.CompilerParams(
    dimension_semantics=("parallel", "parallel"),
    vmem_limit_bytes=32 * 1024 * 1024,
)


# ---------------------------------------------------------------------------
# Kernels (M modality refs as separate inputs; M is a static constant)
# ---------------------------------------------------------------------------
def _make_reduce_kernel(fusion_type: str, num_mods: int):
    def kernel(*refs):
        x_refs, o_ref = refs[:num_mods], refs[num_mods]
        acc = x_refs[0][...].astype(jnp.float32)            # f32 accumulation
        for r in x_refs[1:]:
            v = r[...].astype(jnp.float32)
            if fusion_type == "max":
                acc = jnp.maximum(acc, v)
            else:
                acc = acc + v
        if fusion_type == "mean":
            acc = acc * jnp.float32(1.0 / num_mods)          # scalar mul, no divide
        o_ref[...] = acc.astype(o_ref.dtype)
    return kernel


def _make_masked_mean_kernel(num_mods: int):
    def kernel(*refs):
        x_refs = refs[:num_mods]
        m_refs = refs[num_mods:2 * num_mods]                 # each [TB, 1]
        o_ref = refs[2 * num_mods]
        m0 = m_refs[0][...].astype(jnp.float32)
        num = x_refs[0][...].astype(jnp.float32) * m0        # lane-broadcast mul
        den = m0
        for xr, mr in zip(x_refs[1:], m_refs[1:]):
            m = mr[...].astype(jnp.float32)
            num = num + xr[...].astype(jnp.float32) * m
            den = den + m
        # Guard: rows with zero active modalities (and partial edge-block rows)
        # would otherwise divide by zero; real usage always has >=1 modality.
        den = jnp.maximum(den, 1.0)
        inv = pl.reciprocal(den, approx=False)               # tiny [TB,1] operand
        o_ref[...] = (num * inv).astype(o_ref.dtype)
    return kernel


# ---------------------------------------------------------------------------
# Wrappers (pallas_call plumbing)
# ---------------------------------------------------------------------------
def _reduce_fusion(mods, fusion_type, tile_b=None, tile_h=None):
    M = len(mods)
    B, H = mods[0].shape
    dtype = mods[0].dtype
    itemsize = max(jnp.dtype(dtype).itemsize, 4)
    TB, TH = _pick_tiles(B, H, n_bufs=M + 1, itemsize=itemsize,
                         tile_b=tile_b, tile_h=tile_h)

    spec = pl.BlockSpec((TB, TH), lambda i, j: (i, j))
    return pl.pallas_call(
        _make_reduce_kernel(fusion_type, M),
        out_shape=jax.ShapeDtypeStruct((B, H), dtype),
        grid=(pl.cdiv(B, TB), pl.cdiv(H, TH)),
        in_specs=[spec] * M,
        out_specs=spec,
        compiler_params=_COMPILER_PARAMS,
    )(*mods)


def _masked_mean_fusion(mods, masks, tile_b=None, tile_h=None):
    M = len(mods)
    B, H = mods[0].shape
    out_dtype = jnp.promote_types(mods[0].dtype, jnp.float32)
    itemsize = max(jnp.dtype(mods[0].dtype).itemsize, 4)
    TB, TH = _pick_tiles(B, H, n_bufs=M + 1, itemsize=itemsize,
                         tile_b=tile_b, tile_h=tile_h)

    # Masks: [B] -> [B, 1] float32 so B sits on sublanes matching x.
    mask_cols = [m.reshape(B, 1).astype(jnp.float32) for m in masks]

    x_spec = pl.BlockSpec((TB, TH), lambda i, j: (i, j))
    m_spec = pl.BlockSpec((TB, 1), lambda i, j: (i, 0))
    return pl.pallas_call(
        _make_masked_mean_kernel(M),
        out_shape=jax.ShapeDtypeStruct((B, H), out_dtype),
        grid=(pl.cdiv(B, TB), pl.cdiv(H, TH)),
        in_specs=[x_spec] * M + [m_spec] * M,
        out_specs=x_spec,
        compiler_params=_COMPILER_PARAMS,
    )(*mods, *mask_cols)


def shallow_fusion(x: dict, fusion_type: str = "mean", mask: dict = None,
                   tile_b=None, tile_h=None) -> jax.Array:
    """JAX/Pallas equivalent of ShallowFusion.forward."""
    keys = list(x.keys())
    mods = [x[k] for k in keys]

    if fusion_type == "concat":
        # Pure data movement; no compute -> plain JAX glue.
        return jnp.concatenate(mods, axis=-1)
    if fusion_type in ("mean", "max", "sum"):
        return _reduce_fusion(mods, fusion_type, tile_b, tile_h)
    if fusion_type == "masked_mean":
        masks = [mask[k] for k in keys]
        return _masked_mean_fusion(mods, masks, tile_b, tile_h)
    raise ValueError(f"unknown fusion_type: {fusion_type}")


# ---------------------------------------------------------------------------
# Pure-JAX reference for validation
# ---------------------------------------------------------------------------
def shallow_fusion_ref(x: dict, fusion_type: str = "mean", mask: dict = None):
    mods = list(x.values())
    if fusion_type == "mean":
        return jnp.stack(mods, axis=0).mean(axis=0)
    if fusion_type == "max":
        return jnp.stack(mods, axis=0).max(axis=0)
    if fusion_type == "sum":
        return jnp.stack(mods, axis=0).sum(axis=0)
    if fusion_type == "concat":
        return jnp.concatenate(mods, axis=-1)
    if fusion_type == "masked_mean":
        num = sum(x[k] * mask[k][:, None] for k in x.keys())
        den = sum(mask[k] for k in mask.keys())[:, None].astype(jnp.float32)
        return num / den
    raise ValueError(fusion_type)


# ---------------------------------------------------------------------------
# Main
# ---------------------------------------------------------------------------
if __name__ == "__main__":
    modalities = ["clinical", "rna", "wsi"]
    configs = [
        dict(B=8, H=128, tile_b=None, tile_h=None),   # aligned shapes
        dict(B=5, H=96, tile_b=None, tile_h=None),    # partial edge blocks
        dict(B=16, H=256, tile_b=8, tile_h=128),      # multi-tile grid
    ]

    key = jax.random.PRNGKey(0)
    ok = True
    for cfg in configs:
        B, H = cfg["B"], cfg["H"]
        x = {}
        for name in modalities:
            key, sub = jax.random.split(key)
            x[name] = jax.random.normal(sub, (B, H), dtype=jnp.float32)

        # 0/1 masks; guarantee every row has at least one active modality.
        mask = {}
        for i, name in enumerate(modalities):
            key, sub = jax.random.split(key)
            m = (jax.random.uniform(sub, (B,)) > 0.5).astype(jnp.float32)
            if i == 0:
                m = jnp.ones((B,), dtype=jnp.float32)
            mask[name] = m

        for ftype in ["mean", "max", "sum", "concat", "masked_mean"]:
            out = shallow_fusion(x, fusion_type=ftype, mask=mask,
                                 tile_b=cfg["tile_b"], tile_h=cfg["tile_h"])
            out = jax.block_until_ready(out)
            ref = shallow_fusion_ref(x, fusion_type=ftype, mask=mask)
            if out.shape != ref.shape:
                ok = False
                print(f"[B={B},H={H}] shape mismatch for {ftype}: "
                      f"{out.shape} vs {ref.shape}")
                continue
            err = float(jnp.max(jnp.abs(out - ref)))
            if err > 1e-5:
                ok = False
                print(f"[B={B},H={H}] value mismatch for {ftype}: "
                      f"max abs err = {err}")

    if ok:
        print("KERNEL_OK")
</pallas_src>

<mosaic_0001>
module attributes {stable_mosaic.version = 11 : i64} {
  func.func @kernel(%arg0: i32, %arg1: i32, %arg2: memref<8x128xf32, #tpu.memory_space<vmem>>, %arg3: memref<8x128xf32, #tpu.memory_space<vmem>>, %arg4: memref<8x128xf32, #tpu.memory_space<vmem>>, %arg5: memref<8x128xf32, #tpu.memory_space<vmem>>) attributes {dimension_semantics = [#tpu.dimension_semantics<parallel>, #tpu.dimension_semantics<parallel>], iteration_bounds = array<i64: 1, 1>, scalar_prefetch = 0 : i64, scratch_operands = 0 : i64, tpu.core_type = #tpu.core_type<tc>, window_params = [{transform_indices = @transform_0, window_bounds = array<i64: 8, 128>}, {transform_indices = @transform_1, window_bounds = array<i64: 8, 128>}, {transform_indices = @transform_2, window_bounds = array<i64: 8, 128>}, {transform_indices = @transform_3, window_bounds = array<i64: 8, 128>}]} {
    %c0 = arith.constant 0 : index
    %c0_0 = arith.constant 0 : index
    %0 = vector.load %arg2[%c0, %c0_0] : memref<8x128xf32, #tpu.memory_space<vmem>>, vector<8x128xf32>
    %c0_1 = arith.constant 0 : index
    %c0_2 = arith.constant 0 : index
    %1 = vector.load %arg3[%c0_1, %c0_2] : memref<8x128xf32, #tpu.memory_space<vmem>>, vector<8x128xf32>
    %2 = arith.addf %0, %1 : vector<8x128xf32>
    %c0_3 = arith.constant 0 : index
    %c0_4 = arith.constant 0 : index
    %3 = vector.load %arg4[%c0_3, %c0_4] : memref<8x128xf32, #tpu.memory_space<vmem>>, vector<8x128xf32>
    %4 = arith.addf %2, %3 : vector<8x128xf32>
    %cst = arith.constant 0.333333343 : f32
    %5 = vector.broadcast %cst : f32 to vector<8x128xf32>
    %6 = arith.mulf %4, %5 : vector<8x128xf32>
    %c0_5 = arith.constant 0 : index
    %c0_6 = arith.constant 0 : index
    %7 = vector.load %arg5[%c0_5, %c0_6] : memref<8x128xf32, #tpu.memory_space<vmem>>, vector<8x128xf32>
    tpu.vector_store %arg5[%c0_5, %c0_6], %6 {strides = array<i32>} : memref<8x128xf32, #tpu.memory_space<vmem>>, vector<8x128xf32>,
    return
  }
  func.func @transform_0(%arg0: i32, %arg1: i32) -> (i32, i32) {
    %c0_i32 = arith.constant 0 : i32
    return %arg0, %arg1 : i32, i32
  }
  func.func @transform_1(%arg0: i32, %arg1: i32) -> (i32, i32) {
    %c0_i32 = arith.constant 0 : i32
    return %arg0, %arg1 : i32, i32
  }
  func.func @transform_2(%arg0: i32, %arg1: i32) -> (i32, i32) {
    %c0_i32 = arith.constant 0 : i32
    return %arg0, %arg1 : i32, i32
  }
  func.func @transform_3(%arg0: i32, %arg1: i32) -> (i32, i32) {
    %c0_i32 = arith.constant 0 : i32
    return %arg0, %arg1 : i32, i32
  }
}

</mosaic_0001>

<bundles_post_ra>
// kernel: tpu_custom_call.1
= control target key start
LH: loop header
LB: loop body
LE: loop exit
PB: predicated region body
PF: predicated region fallthrough
CT: control target
= control target key end

     0   :  { %8 = vsyncpa [#allocation3], 0  ;;  %s243_s0 = inlined_call_operand.hbm [shape: f32[8,128], index: 0, kind: input, shape index: {}]   ;;  %s244_s1 = inlined_call_operand.hbm [shape: f32[8,128], index: 1, kind: input, shape index: {}]   ;;  %s245_s2 = inlined_call_operand.hbm [shape: f32[8,128], index: 2, kind: input, shape index: {}]   ;;  %s246_s3 = inlined_call_operand.hbm [shape: f32[8,128], index: 3, kind: output, shape index: {}]  }
   0x1   :  { %9 = vsyncpa [#allocation6], 0 }
   0x2   :  { %10 = vsyncpa [#allocation4], 0  ;;  %s171_s12 = smov [#allocation5]   ;;  %s172_s14 = smov [#allocation2]  }
   0x3   :  { %s27_s13 = sshll.u32 %s171_s12, 4  ;;  %s17_s15 = sshll.u32 %s172_s14, 4  ;;  %s28_s13 = int_to_ptr.vmem [resolvable:$true] %s27_s13  ;;  %s18_s15 = int_to_ptr.vmem [resolvable:$true] %s17_s15 }
   0x4   :  { %s77_s18 = scalar_lea.hbm %s244_s1, 128 }
   0x5   :  { %p78_p0 = scmp.ne.s32.totalorder %s244_s1, %s77_s18  ;;  %p81_p1 = scmp.lt.u32.totalorder %s77_s18, %s244_s1 }
   0x7   :  { %p83_p2 = pnand %p81_p1, %p78_p0 }
   0x9   :  { %86 = shalt.err (!%p83_p2)
}
   0xa   :  { %s87_s23 = scalar_lea.vmem %s28_s13, 128  ;;  %p92_p4 = scmp.lt.s32.totalorder %s28_s13, %s28_s13 }
   0xb   :  { %p88_p3 = scmp.ne.s32.totalorder %s28_s13, %s87_s23  ;;  %p93_p5 = scmp.lt.s32.totalorder %s87_s23, %s87_s23 }
   0xd   :  { %p94_p6 = por %p93_p5, %p92_p4 }
   0xf   :  { %p95_p7 = pnand %p94_p6, %p88_p3 }
  0x11   :  { %98 = shalt.err (!%p95_p7)
}
  0x12   :  { %30 = dma.hbm_to_vmem [thread:$0]  %s244_s1, 128, %s28_s13, [#allocation6]  }
  0x13   :  { %s99_s28 = scalar_lea.hbm %s243_s0, 128 }
  0x14   :  { %p100_p8 = scmp.ne.s32.totalorder %s243_s0, %s99_s28  ;;  %p103_p9 = scmp.lt.u32.totalorder %s99_s28, %s243_s0 }
  0x16   :  { %p105_p10 = pnand %p103_p9, %p100_p8 }
  0x18   :  { %108 = shalt.err (!%p105_p10)
}
  0x19   :  { %s109_s6 = scalar_lea.vmem %s18_s15, 128  ;;  %p114_p12 = scmp.lt.s32.totalorder %s18_s15, %s18_s15 }
  0x1a   :  { %p110_p11 = scmp.ne.s32.totalorder %s18_s15, %s109_s6  ;;  %p115_p13 = scmp.lt.s32.totalorder %s109_s6, %s109_s6 }
  0x1c   :  { %p116_p0 = por %p115_p13, %p114_p12 }
  0x1e   :  { %p117_p1 = pnand %p116_p0, %p110_p11 }
  0x20   :  { %120 = shalt.err (!%p117_p1)
}
  0x21   :  { %20 = dma.hbm_to_vmem [thread:$0]  %s243_s0, 128, %s18_s15, [#allocation3]  }
  0x22   :  { %s173_s8 = smov [#allocation7]   ;;  %s121_s12 = scalar_lea.hbm %s245_s2, 128 }
  0x23   :  { %s37_s9 = sshll.u32 %s173_s8, 4  ;;  %p122_p2 = scmp.ne.s32.totalorder %s245_s2, %s121_s12  ;;  %s38_s9 = int_to_ptr.vmem [resolvable:$true] %s37_s9 }
  0x24   :  { %p125_p3 = scmp.lt.u32.totalorder %s121_s12, %s245_s2 }
  0x26   :  { %p127_p4 = pnand %p125_p3, %p122_p2 }
  0x28   :  { %130 = shalt.err (!%p127_p4)
}
  0x29   :  { %s131_s18 = scalar_lea.vmem %s38_s9, 128  ;;  %p136_p6 = scmp.lt.s32.totalorder %s38_s9, %s38_s9 }
  0x2a   :  { %p132_p5 = scmp.ne.s32.totalorder %s38_s9, %s131_s18  ;;  %p137_p7 = scmp.lt.s32.totalorder %s131_s18, %s131_s18 }
  0x2c   :  { %p138_p8 = por %p137_p7, %p136_p6 }
  0x2e   :  { %p139_p9 = pnand %p138_p8, %p132_p5 }
  0x30   :  { %142 = shalt.err (!%p139_p9)
}
  0x31   :  { %40 = dma.hbm_to_vmem [thread:$0]  %s245_s2, 128, %s38_s9, [#allocation6]  }
  0x32   :  { %165 = dma.done.wait [#allocation3], 128  }
  0x33   :  { %166 = vsyncadd [#allocation3], 4294967168 }
  0x34   :  { %167 = dma.done.wait [#allocation6], 256  }
  0x35   :  { %168 = vsyncadd [#allocation6], 4294967040  ;;  %v50_v0 = vld [vmem:[#allocation2] sm:$0xff]  ;;  %v51_v1 = vld [vmem:[#allocation5] sm:$0xff]  ;;  %s174_s19 = smov [#allocation8]  }
  0x36   :  { %v53_v2 = vld [vmem:[#allocation7] sm:$0xff]  ;;  %v52_v3 = vadd.f32 %v51_v1, %v50_v0  ;;  %s63_s20 = sshll.u32 %s174_s19, 4  ;;  %s64_s20 = int_to_ptr.vmem [resolvable:$true] %s63_s20 }
  0x37   :  { %s143_s21 = scalar_lea.vmem %s64_s20, 128  ;;  %p148_p11 = scmp.lt.s32.totalorder %s64_s20, %s64_s20 }
  0x38   :  { %v54_v4 = vadd.f32 %v53_v2, %v52_v3  ;;  %p144_p10 = scmp.ne.s32.totalorder %s64_s20, %s143_s21  ;;  %p149_p12 = scmp.lt.s32.totalorder %s143_s21, %s143_s21 }
  0x3a   :  { %v55_v5 = vmul.f32 0.33333334, %v54_v4  ;;  %p150_p13 = por %p149_p12, %p148_p11 }
  0x3c   :  { %56 = vst [vmem:[#allocation8] sm:$0xff] %v55_v5  ;;  %p151_p0 = pnand %p150_p13, %p144_p10 }
  0x3e   :  { %154 = shalt.err (!%p151_p0)
}
  0x3f   :  { %s155_s23 = scalar_lea.hbm %s246_s3, 128 }
  0x40   :  { %p156_p1 = scmp.ne.s32.totalorder %s246_s3, %s155_s23  ;;  %p159_p2 = scmp.lt.u32.totalorder %s155_s23, %s246_s3 }
  0x42   :  { %p161_p3 = pnand %p159_p2, %p156_p1 }
  0x44   :  { %164 = shalt.err (!%p161_p3)
}
  0x45   :  { %66 = dma.vmem_to_hbm [thread:$0]  %s64_s20, 128, %s246_s3, [#allocation4]  }
  0x46   :  { %169 = dma.done.wait [#allocation4], 128  }
  0x47   :  { %170 = vsyncadd [#allocation4], 4294967168 }
  0x48   :  { %70 = vsyncpa [#allocation3], 1 }
  0x49   :  { %71 = vsyncpa [#allocation6], 1 }
  0x4a   :  { %72 = vsyncpa [#allocation4], 1 }

</bundles_post_ra>
